<compile_context>
chip_gen: v7x
topology: tpu7x:2x2x1
jax: 0.10.0
libtpu: 0.0.40
codegen_flags: <defaults>
</compile_context>

<pallas_src>
import jax
import jax.numpy as jnp
from jax.experimental import pallas as pl
from jax.experimental.pallas import tpu as pltpu


def _resolve_shape(total, shape):
    """Resolve a single -1 dim like torch.Tensor.view does."""
    if len(shape) == 1 and isinstance(shape[0], (tuple, list)):
        shape = tuple(shape[0])
    shape = list(shape)
    if -1 in shape:
        idx = shape.index(-1)
        known = 1
        for i, s in enumerate(shape):
            if i != idx:
                known *= int(s)
        assert known > 0 and total % known == 0, "view: size mismatch"
        shape[idx] = total // known
    prod = 1
    for s in shape:
        prod *= int(s)
    assert prod == total, "view: size mismatch"
    return tuple(int(s) for s in shape)


def _dma_copy_kernel(x_hbm, o_hbm, sem):
    # Single HBM->HBM DMA: the DMA engine moves the whole tensor at HBM rate.
    # No grid, no VMEM round trip, no per-grid-step overhead.
    cp = pltpu.make_async_copy(x_hbm, o_hbm, sem)
    cp.start()
    cp.wait()


def _materialized_copy(x):
    """Materialize a fresh HBM buffer holding a bit-exact copy of `x`."""
    nbytes = int(x.size) * jnp.dtype(x.dtype).itemsize
    return pl.pallas_call(
        _dma_copy_kernel,
        out_shape=jax.ShapeDtypeStruct(x.shape, x.dtype),
        in_specs=[pl.BlockSpec(memory_space=pl.ANY)],
        out_specs=pl.BlockSpec(memory_space=pl.ANY),
        scratch_shapes=[pltpu.SemaphoreType.DMA],
        # Purely memory-bound custom call; help XLA's scheduler overlap it.
        cost_estimate=pl.CostEstimate(
            flops=0, transcendentals=0, bytes_accessed=2 * nbytes),
    )(x)


def reshape_net(x, *shape, materialize_copy=False):
    """Pallas-backed equivalent of ReshapeNet(*shape)(x) == x.view(*shape).

    Default path is the metadata-only reshape (a contiguous row-major view
    costs no data movement).  Set materialize_copy=True only if a physically
    separate output buffer is genuinely required; it is produced by one
    HBM->HBM DMA on the native dtype.
    """
    total = int(x.size)
    out_shape = _resolve_shape(total, shape)
    out = jnp.reshape(x, out_shape)          # metadata-only: the real "view"
    if materialize_copy and total > 0:
        out = _materialized_copy(out)        # single full-tensor HBM->HBM DMA
    return out


class ReshapeNet:
    """Mirror of the PyTorch ReshapeNet module (x.view(self.shape))."""

    def __init__(self, *args, materialize_copy=False):
        self.shape = args
        self.materialize_copy = materialize_copy

    def __call__(self, x):
        return reshape_net(x, *self.shape,
                           materialize_copy=self.materialize_copy)


if __name__ == "__main__":
    key = jax.random.PRNGKey(0)

    # Small NCHW-style input consistent with a typical ReshapeNet use:
    # flatten spatial dims: (2, 4, 16, 16) -> (2, 4, 256)
    x = jax.random.normal(key, (2, 4, 16, 16), dtype=jnp.float32)

    # Default (recommended) path: metadata-only view.
    net = ReshapeNet(2, 4, 256)
    y = jax.block_until_ready(net(x))
    ref = jnp.reshape(x, (2, 4, 256))
    assert y.shape == (2, 4, 256), y.shape
    assert y.dtype == x.dtype
    assert bool(jnp.all(y == ref))

    # -1 inference path like x.view(2, -1).
    y2 = jax.block_until_ready(reshape_net(x, 2, -1))
    assert y2.shape == (2, 1024)
    assert bool(jnp.all(y2 == jnp.reshape(x, (2, 1024))))

    # Explicit materialized-copy path: exercises the Pallas HBM->HBM DMA kernel.
    y3 = jax.block_until_ready(reshape_net(x, 2, -1, materialize_copy=True))
    assert y3.shape == (2, 1024)
    assert bool(jnp.all(y3 == jnp.reshape(x, (2, 1024))))

    # bf16 native-dtype DMA copy (no wrapper-side int32 bitcast plumbing).
    xb = jax.random.normal(jax.random.PRNGKey(0), (2, 8, 32, 32),
                           dtype=jnp.bfloat16)
    y4 = jax.block_until_ready(reshape_net(xb, 2, -1, materialize_copy=True))
    assert y4.shape == (2, 8 * 32 * 32)
    assert y4.dtype == xb.dtype
    assert bool(jnp.all(y4 == jnp.reshape(xb, (2, 8 * 32 * 32))))

    print("KERNEL_OK")
</pallas_src>

<mosaic_0001>
module attributes {stable_mosaic.version = 11 : i64} {
  func.func @_dma_copy_kernel(%arg0: memref<2x1024xf32, #tpu.memory_space<any>>, %arg1: memref<2x1024xf32, #tpu.memory_space<any>>, %arg2: memref<!tpu.dma_semaphore, #tpu.memory_space<semaphore_mem>>) attributes {dimension_semantics = [], scalar_prefetch = 0 : i64, scratch_operands = 1 : i64, tpu.core_type = #tpu.core_type<tc>} {
    tpu.enqueue_dma source(%arg0 : memref<2x1024xf32, #tpu.memory_space<any>>) target(%arg1 : memref<2x1024xf32, #tpu.memory_space<any>>) target_semaphore(%arg2 : memref<!tpu.dma_semaphore, #tpu.memory_space<semaphore_mem>>)
    tpu.wait_dma2 semaphore(%arg2 : memref<!tpu.dma_semaphore, #tpu.memory_space<semaphore_mem>>) src(%arg0 : memref<2x1024xf32, #tpu.memory_space<any>>) dst(%arg1 : memref<2x1024xf32, #tpu.memory_space<any>>)
    return
  }
}

</mosaic_0001>

<bundles_post_ra>
// kernel: tpu_custom_call.1
= control target key start
LH: loop header
LB: loop body
LE: loop exit
PB: predicated region body
PF: predicated region fallthrough
CT: control target
= control target key end

     0   :  { %s35_s6 = smov [#allocation2]   ;;  %s36_s7 = smov [#allocation3]   ;;  %s54_s0 = inlined_call_operand.hbm [shape: f32[2,1024], index: 0, kind: input, shape index: {}]   ;;  %s55_s1 = inlined_call_operand.hbm [shape: f32[2,1024], index: 1, kind: output, shape index: {}]  }
   0x1   :  { %s37_s8 = smov 0  }
   0x2   :  { %18 = dma.general %s54_s0, 256, %s55_s1, %s35_s6, %s36_s7, [#allocation4], %s37_s8, 0  }
   0x3   :  { %33 = dma.done.wait [#allocation2], 256 }
   0x4   :  { %34 = vsyncadd [#allocation2], 4294967040 }
   0x5   :  { %23 = vsyncmov [#allocation2] }
   0x8   :  { %s24_s13 = vpop.sfrf %23 }
   0x9   :  { %p29_p0 = scmp.ne.s32.totalorder %s24_s13, 0 }
   0xb   :  { %28 = shalt.err (%p29_p0)  }

</bundles_post_ra>
